<compile_context>
chip_gen: v6e
topology: v6e:2x2x1
jax: 0.10.0
libtpu: 0.0.40
codegen_flags: <defaults>
</compile_context>

<pallas_src>
import jax
import jax.numpy as jnp
from jax.experimental import pallas as pl
from jax.experimental.pallas import tpu as pltpu

# Folded slope/bias per branch (constants precomputed in double, rounded once).
_SLOPE_A = -0.0773
_BIAS_A = -(0.0773 * 3.0 + 0.004)        # -0.2359
_SLOPE_B = 0.1587                         # bias folds exactly to 0
_SLOPE_C = 0.8413
_SLOPE_D = 1.0773
_BIAS_D = 0.8413 - 1.0773                 # -0.2360

_LANE_WIDTHS = (2048, 1024, 512, 256, 128)
_TARGET_BLOCK_BYTES = 2 << 20   # 2 MiB per block
_MIN_PIPELINE_BYTES = 256 << 10  # below this, a single block is fine


def _piecewise_f32(x32):
    """Folded piecewise map on f32 values. Ordered single-bound selects: each later
    `where` overrides earlier ones, so an element gets the branch of the highest
    threshold it satisfies."""
    y = x32                                                   # x < -3 : unchanged
    y = jnp.where(x32 >= -3.0, _SLOPE_A * x32 + _BIAS_A, y)
    y = jnp.where(x32 >= -1.0, _SLOPE_B * x32, y)
    y = jnp.where(x32 >= 0.0, _SLOPE_C * x32, y)
    y = jnp.where(x32 >= 1.0, _SLOPE_D * x32 + _BIAS_D, y)
    return jnp.where(x32 >= 3.0, x32, y)                      # x >= 3 : unchanged


def _linear_gelu2_kernel(x_ref, o_ref):
    # Single explicit up-cast (v5e VPU has no bf16 ALUs), compute in f32, one
    # down-cast at the store.
    x32 = x_ref[...].astype(jnp.float32)
    o_ref[...] = _piecewise_f32(x32).astype(o_ref.dtype)


def _cdiv(a: int, b: int) -> int:
    return (a + b - 1) // b


def _choose_block_rows(rows: int, row_bytes: int) -> int:
    """Byte-based block sizing: ~2 MiB blocks, multiple of 32 rows, and keep >= ~4
    grid steps whenever the array is big enough for pipelining to matter."""
    total_bytes = rows * row_bytes
    if total_bytes <= _MIN_PIPELINE_BYTES or rows <= 32:
        return rows  # block == full array dims is always a legal block shape
    by_bytes = max(1, _TARGET_BLOCK_BYTES // row_bytes)
    by_steps = _cdiv(rows, 4)  # keep at least ~4 grid steps
    block_rows = min(by_bytes, by_steps)
    block_rows = max(32, (block_rows // 32) * 32)  # multiple of 32: valid for f32/bf16/int8
    return min(block_rows, rows)


@jax.jit
def linear_gelu2(x: jax.Array) -> jax.Array:
    """Elementwise piecewise-linear GELU2 matching the PyTorch reference."""
    orig_shape = x.shape
    dtype = x.dtype
    n = x.size
    if n == 0:
        return x

    flat = x.reshape(-1)

    # Widest lane-dense last dim that divides n; otherwise width=128 and a <128-elem
    # tail is handled outside the kernel (no padding copy, no post-slice copy).
    width = next((w for w in _LANE_WIDTHS if n % w == 0), 128)
    n_main = (n // width) * width

    if n_main == 0:
        # Tiny (<128 elems): one fused VPU pass in plain JAX is already optimal.
        return _piecewise_f32(flat.astype(jnp.float32)).astype(dtype).reshape(orig_shape)

    rows = n_main // width
    itemsize = jnp.dtype(dtype).itemsize
    block_rows = _choose_block_rows(rows, width * itemsize)
    grid = (_cdiv(rows, block_rows),)  # partial last block is masked by Pallas

    x2d = flat[:n_main].reshape(rows, width)

    out2d = pl.pallas_call(
        _linear_gelu2_kernel,
        out_shape=jax.ShapeDtypeStruct((rows, width), dtype),
        grid=grid,
        in_specs=[pl.BlockSpec((block_rows, width), lambda i: (i, 0))],
        out_specs=pl.BlockSpec((block_rows, width), lambda i: (i, 0)),
        compiler_params=pltpu.CompilerParams(
            dimension_semantics=("parallel",),  # shards grid across TCs on v7x megacore
        ),
        cost_estimate=pl.CostEstimate(
            flops=16 * rows * width,            # 5 cmp + 5 sel + 4 mul + 2 add per elem
            transcendentals=0,
            bytes_accessed=2 * rows * width * itemsize,
        ),
    )(x2d)

    out_flat = out2d.reshape(-1)
    if n_main != n:
        # Misaligned tail (<128 elems): plain fused jnp.where, then a single concat.
        tail = _piecewise_f32(flat[n_main:].astype(jnp.float32)).astype(dtype)
        out_flat = jnp.concatenate([out_flat, tail])
    return out_flat.reshape(orig_shape)


def _reference(x: jnp.ndarray) -> jnp.ndarray:
    """Pure-JAX reference: unfolded formulas, two-sided conditions (matches PyTorch)."""
    y = x
    y = jnp.where((x >= -3.0) & (x < -1.0), -0.0773 * (x + 3.0) - 0.004, y)
    y = jnp.where((x >= -1.0) & (x < 0.0), 0.1587 * (x + 1.0) - 0.1587, y)
    y = jnp.where((x >= 0.0) & (x < 1.0), 0.8413 * x, y)
    y = jnp.where((x >= 1.0) & (x < 3.0), 1.0773 * (x - 1.0) + 0.8413, y)
    return y


if __name__ == "__main__":
    key = jax.random.PRNGKey(0)
    k1, k2, k3 = jax.random.split(key, 3)

    # 1) NCHW input consistent with the module; scaled so every piecewise region fires.
    x = jax.random.normal(k1, (2, 4, 16, 16), dtype=jnp.float32) * 2.5
    out = jax.block_until_ready(linear_gelu2(x))
    assert out.shape == x.shape and out.dtype == x.dtype
    assert jnp.allclose(out, _reference(x), atol=1e-5, rtol=1e-5)

    # 2) Misaligned size -> aligned-prefix Pallas pass + jnp tail (no pad/slice copies).
    x_odd = jax.random.normal(k2, (5, 300), dtype=jnp.float32) * 2.5
    out_odd = jax.block_until_ready(linear_gelu2(x_odd))
    assert out_odd.shape == x_odd.shape
    assert jnp.allclose(out_odd, _reference(x_odd), atol=1e-5, rtol=1e-5)

    # 3) Multi-step grid with a partial (masked) last block: rows=100, block_rows=32.
    x_big = jax.random.normal(k3, (100, 2048), dtype=jnp.float32) * 2.5
    out_big = jax.block_until_ready(linear_gelu2(x_big))
    assert jnp.allclose(out_big, _reference(x_big), atol=1e-5, rtol=1e-5)

    # 4) bf16 path: single in-kernel f32 up-cast/down-cast pair.
    x_bf = (jax.random.normal(k1, (4, 8, 128), dtype=jnp.float32) * 2.5).astype(jnp.bfloat16)
    out_bf = jax.block_until_ready(linear_gelu2(x_bf))
    assert out_bf.dtype == jnp.bfloat16
    assert jnp.allclose(out_bf.astype(jnp.float32),
                        _reference(x_bf.astype(jnp.float32)), atol=2e-2, rtol=2e-2)

    print("KERNEL_OK")
</pallas_src>

<mosaic_0001>
module attributes {stable_mosaic.version = 11 : i64} {
  func.func @_linear_gelu2_kernel(%arg0: i32, %arg1: memref<1x2048xf32, #tpu.memory_space<vmem>>, %arg2: memref<1x2048xf32, #tpu.memory_space<vmem>>) attributes {dimension_semantics = [#tpu.dimension_semantics<parallel>], iteration_bounds = array<i64: 1>, scalar_prefetch = 0 : i64, scratch_operands = 0 : i64, tpu.core_type = #tpu.core_type<tc>, window_params = [{transform_indices = @transform_0, window_bounds = array<i64: 1, 2048>}, {transform_indices = @transform_1, window_bounds = array<i64: 1, 2048>}]} {
    %c0 = arith.constant 0 : index
    %c0_0 = arith.constant 0 : index
    %0 = vector.load %arg1[%c0, %c0_0] : memref<1x2048xf32, #tpu.memory_space<vmem>>, vector<1x2048xf32>
    %cst = arith.constant -3.000000e+00 : f32
    %1 = vector.broadcast %cst : f32 to vector<1x2048xf32>
    %2 = arith.cmpf oge, %0, %1 : vector<1x2048xf32>
    %cst_1 = arith.constant -7.730000e-02 : f32
    %3 = vector.broadcast %cst_1 : f32 to vector<1x2048xf32>
    %4 = arith.mulf %3, %0 : vector<1x2048xf32>
    %cst_2 = arith.constant -2.359000e-01 : f32
    %5 = vector.broadcast %cst_2 : f32 to vector<1x2048xf32>
    %6 = arith.addf %4, %5 : vector<1x2048xf32>
    %7 = arith.select %2, %6, %0 : vector<1x2048xi1>, vector<1x2048xf32>
    %cst_3 = arith.constant -1.000000e+00 : f32
    %8 = vector.broadcast %cst_3 : f32 to vector<1x2048xf32>
    %9 = arith.cmpf oge, %0, %8 : vector<1x2048xf32>
    %cst_4 = arith.constant 1.587000e-01 : f32
    %10 = vector.broadcast %cst_4 : f32 to vector<1x2048xf32>
    %11 = arith.mulf %10, %0 : vector<1x2048xf32>
    %12 = arith.select %9, %11, %7 : vector<1x2048xi1>, vector<1x2048xf32>
    %cst_5 = arith.constant 0.000000e+00 : f32
    %13 = vector.broadcast %cst_5 : f32 to vector<1x2048xf32>
    %14 = arith.cmpf oge, %0, %13 : vector<1x2048xf32>
    %cst_6 = arith.constant 8.413000e-01 : f32
    %15 = vector.broadcast %cst_6 : f32 to vector<1x2048xf32>
    %16 = arith.mulf %15, %0 : vector<1x2048xf32>
    %17 = arith.select %14, %16, %12 : vector<1x2048xi1>, vector<1x2048xf32>
    %cst_7 = arith.constant 1.000000e+00 : f32
    %18 = vector.broadcast %cst_7 : f32 to vector<1x2048xf32>
    %19 = arith.cmpf oge, %0, %18 : vector<1x2048xf32>
    %cst_8 = arith.constant 1.077300e+00 : f32
    %20 = vector.broadcast %cst_8 : f32 to vector<1x2048xf32>
    %21 = arith.mulf %20, %0 : vector<1x2048xf32>
    %cst_9 = arith.constant -2.360000e-01 : f32
    %22 = vector.broadcast %cst_9 : f32 to vector<1x2048xf32>
    %23 = arith.addf %21, %22 : vector<1x2048xf32>
    %24 = arith.select %19, %23, %17 : vector<1x2048xi1>, vector<1x2048xf32>
    %cst_10 = arith.constant 3.000000e+00 : f32
    %25 = vector.broadcast %cst_10 : f32 to vector<1x2048xf32>
    %26 = arith.cmpf oge, %0, %25 : vector<1x2048xf32>
    %27 = arith.select %26, %0, %24 : vector<1x2048xi1>, vector<1x2048xf32>
    %c0_11 = arith.constant 0 : index
    %c0_12 = arith.constant 0 : index
    %28 = vector.load %arg2[%c0_11, %c0_12] : memref<1x2048xf32, #tpu.memory_space<vmem>>, vector<1x2048xf32>
    tpu.vector_store %arg2[%c0_11, %c0_12], %27 {strides = array<i32>} : memref<1x2048xf32, #tpu.memory_space<vmem>>, vector<1x2048xf32>,
    return
  }
  func.func @transform_0(%arg0: i32) -> (i32, i32) {
    %c0_i32 = arith.constant 0 : i32
    %c0_i32_0 = arith.constant 0 : i32
    return %arg0, %c0_i32 : i32, i32
  }
  func.func @transform_1(%arg0: i32) -> (i32, i32) {
    %c0_i32 = arith.constant 0 : i32
    %c0_i32_0 = arith.constant 0 : i32
    return %arg0, %c0_i32 : i32, i32
  }
}

</mosaic_0001>

<bundles_post_ra>
// kernel: linear_gelu2.1
= control target key start
LH: loop header
LB: loop body
LE: loop exit
PB: predicated region body
PF: predicated region fallthrough
CT: control target
= control target key end

     0   :  { %s72_s0 = inlined_call_operand.vmem [shape: f32[1,2048], index: 0, kind: input, shape index: {}]   ;;  %s73_s1 = inlined_call_operand.vmem [shape: f32[1,2048], index: 1, kind: output, shape index: {}]  }
   0x1   :  { %v8_v0 = vld [vmem:[%s72_s0] sm:$0xff]  ;;  %v9_v1 = vld [vmem:[%s72_s0 + $0x8] sm:$0xff] }
   0x2   :  { %vm10_vm0 = vcmp.ge.f32.partialorder %v8_v0, -3.0  ;;  %v12_v2 = vmul.f32 -0.0773, %v8_v0  ;;  %vm18_vm1 = vcmp.ge.f32.partialorder %v8_v0, -1.0  ;;  %v20_v3 = vmul.f32 0.1587, %v8_v0 }
   0x3   :  { %vm24_vm2 = vcmp.ge.f32.partialorder %v8_v0, 0.0  ;;  %v32_v4 = vmul.f32 1.0773, %v8_v0  ;;  %v26_v6 = vmul.f32 0.8413, %v8_v0  ;;  %vm30_vm3 = vcmp.ge.f32.partialorder %v8_v0, 1.0 }
   0x4   :  { %v14_v5 = vadd.f32 -0.2359, %v12_v2  ;;  %v13_v7 = vmul.f32 -0.0773, %v9_v1  ;;  %vm11_vm4 = vcmp.ge.f32.partialorder %v9_v1, -3.0  ;;  %vm19_vm5 = vcmp.ge.f32.partialorder %v9_v1, -1.0 }
   0x5   :  { %v34_v8 = vadd.f32 -0.236, %v32_v4  ;;  %v21_v9 = vmul.f32 0.1587, %v9_v1  ;;  %v27_v12 = vmul.f32 0.8413, %v9_v1 }
   0x6   :  { %v16_v10 = vsel %vm10_vm0, %v14_v5, %v8_v0  ;;  %v15_v11 = vadd.f32 -0.2359, %v13_v7  ;;  %vm38_vm6 = vcmp.ge.f32.partialorder %v8_v0, 3.0  ;;  %vm25_vm7 = vcmp.ge.f32.partialorder %v9_v1, 0.0 }
   0x7   :  { %v22_v13 = vsel %vm18_vm1, %v20_v3, %v16_v10  ;;  %v33_v14 = vmul.f32 1.0773, %v9_v1  ;;  %vm31_vm8 = vcmp.ge.f32.partialorder %v9_v1, 1.0  ;;  %vm39_vm9 = vcmp.ge.f32.partialorder %v9_v1, 3.0 }
   0x8   :  { %v28_v15 = vsel %vm24_vm2, %v26_v6, %v22_v13  ;;  %v17_v16 = vsel %vm11_vm4, %v15_v11, %v9_v1 }
   0x9   :  { %v36_v17 = vsel %vm30_vm3, %v34_v8, %v28_v15  ;;  %v23_v18 = vsel %vm19_vm5, %v21_v9, %v17_v16  ;;  %v35_v19 = vadd.f32 -0.236, %v33_v14 }
   0xa   :  { %v40_v20 = vsel %vm38_vm6, %v8_v0, %v36_v17  ;;  %v29_v21 = vsel %vm25_vm7, %v27_v12, %v23_v18 }
   0xb   :  { %42 = vst [vmem:[%s73_s1] sm:$0xff] %v40_v20  ;;  %v37_v22 = vsel %vm31_vm8, %v35_v19, %v29_v21 }
   0xc   :  { %v41_v23 = vsel %vm39_vm9, %v9_v1, %v37_v22 }
   0xd   :  { %43 = vst [vmem:[%s73_s1 + $0x8] sm:$0xff] %v41_v23 }

</bundles_post_ra>
